<compile_context>
chip_gen: v6e
topology: v6e:2x2x1
jax: 0.10.0
libtpu: 0.0.40
codegen_flags: <defaults>
</compile_context>

<pallas_src>
import functools
import math
from typing import NamedTuple

import jax
import jax.numpy as jnp
from jax.experimental import pallas as pl
from jax.experimental.pallas import tpu as pltpu


def _round_up(x, m):
    return (x + m - 1) // m * m


# ---------------------------------------------------------------------------
# Pallas kernel: one batch block of 3x3 "same" conv + bias + ReLU as a single
# fused matmul (KH taps folded into the contraction dimension).
# ---------------------------------------------------------------------------
def _conv_relu_kernel(x_ref, wk_ref, b_ref, o_ref, *, KH, H):
    # x_ref : (bt, Hp_pad, K1)    bf16   padded input slabs (K1 = rup(Wp*Cin,128))
    # wk_ref: (KH*K1, W*Cout_p)   bf16   block-banded weights, taps stacked along K
    # b_ref : (1, W*Cout_p)       f32    bias tiled along W
    # o_ref : (bt*H, W*Cout_p)    f32    lane-dense output slab
    K1 = x_ref.shape[2]
    M = o_ref.shape[0]
    # im2col along H only: KH sublane-offset row slabs stacked along lanes.
    lhs = jnp.concatenate(
        [x_ref[:, kh:kh + H, :].reshape(M, K1) for kh in range(KH)], axis=-1)
    out = jnp.dot(lhs, wk_ref[...], preferred_element_type=jnp.float32)
    out = out + b_ref[...]                       # f32 epilogue (fused, no scratch)
    o_ref[...] = jnp.maximum(out, 0.0).astype(o_ref.dtype)


# ---------------------------------------------------------------------------
# Static geometry / padding config (hashable -> usable as a jit static arg).
# ---------------------------------------------------------------------------
class ConvReLUConfig(NamedTuple):
    Cin: int
    Cout: int
    H: int
    W: int
    padding: int
    KH: int
    KW: int
    Hp: int
    Wp: int
    Hp_pad: int
    K1: int
    Cout_p: int
    WCp: int


# ---------------------------------------------------------------------------
# Wrapper-side weight expansion: OIHW -> block-banded (KH*K1, W*Cout_p).
#   Wk[kh*K1 + (w+kw)*Cin + ci, w*Cout_p + co] = w_oihw[co, ci, kh, kw]
# ---------------------------------------------------------------------------
def _expand_weights(w_oihw, cfg, dtype):
    Cout, Cin, KH, KW = w_oihw.shape
    W, Wp, K1, Cout_p = cfg.W, cfg.Wp, cfg.K1, cfg.Cout_p
    w_hwio = jnp.transpose(w_oihw.astype(jnp.float32), (2, 3, 1, 0))  # (KH,KW,Cin,Cout)
    if Cout_p != Cout:
        w_hwio = jnp.pad(w_hwio, ((0, 0), (0, 0), (0, 0), (0, Cout_p - Cout)))
    wp_idx = jnp.arange(Wp)[:, None]                    # (Wp, 1)
    w_idx = jnp.arange(W)[None, :]                      # (1, W)
    kw_idx = wp_idx - w_idx                             # (Wp, W)
    valid = (kw_idx >= 0) & (kw_idx < KW)
    kw_c = jnp.clip(kw_idx, 0, KW - 1)
    big = w_hwio[:, kw_c]                               # (KH, Wp, W, Cin, Cout_p)
    big = jnp.where(valid[None, :, :, None, None], big, 0.0)
    wk = jnp.transpose(big, (0, 1, 3, 2, 4)).reshape(KH, Wp * Cin, W * Cout_p)
    if K1 != Wp * Cin:
        wk = jnp.pad(wk, ((0, 0), (0, K1 - Wp * Cin), (0, 0)))
    return wk.reshape(KH * K1, W * Cout_p).astype(dtype)


def prepare_fan_in_conv_relu(w_oihw, bias, *, H, W, padding=1):
    """Once-per-weight-update preprocessing (hoisted out of the forward path)."""
    Cout, Cin, KH, KW = (int(d) for d in w_oihw.shape)
    Hp, Wp = H + 2 * padding, W + 2 * padding
    Hp_pad = _round_up(Hp, 8)                     # sublane-aligned image slabs
    K1 = _round_up(Wp * Cin, 128)                 # lane-dense input rows
    cout_mult = 128 // math.gcd(W, 128)
    Cout_p = _round_up(Cout, cout_mult)           # lane-dense output columns
    WCp = W * Cout_p
    cfg = ConvReLUConfig(Cin=Cin, Cout=Cout, H=H, W=W, padding=padding,
                         KH=KH, KW=KW, Hp=Hp, Wp=Wp, Hp_pad=Hp_pad,
                         K1=K1, Cout_p=Cout_p, WCp=WCp)
    wk = _expand_weights(w_oihw, cfg, jnp.bfloat16)                 # (KH*K1, WCp)
    b_pad = jnp.pad(bias.astype(jnp.float32), (0, Cout_p - Cout))
    b_big = jnp.tile(b_pad, W).reshape(1, WCp)                      # (1, WCp)
    return (wk, b_big), cfg


# ---------------------------------------------------------------------------
# Generation-aware blocking / VMEM budgeting.
# ---------------------------------------------------------------------------
def _tpu_vmem_and_cores():
    """Best-effort (per-core VMEM bytes, has-2-TensorCores-per-chip)."""
    vmem = None
    try:
        vmem = int(pltpu.get_tpu_info().vmem_capacity_bytes)
    except Exception:
        vmem = None
    if not vmem or vmem <= 0:
        vmem = 64 * 1024 * 1024                  # conservative: v7x-sized VMEM
    # v7x: 64 MiB VMEM/core & 2 TCs/chip; v5e/v6e: 128 MiB & 1 TC.
    two_cores = vmem < 100 * 1024 * 1024
    return vmem, two_cores


def _pick_block_b(B, H, per_image_bytes, fixed_bytes, vmem_cap, two_cores):
    """Largest batch block that fits VMEM; on 2-TC chips keep >= 2 grid steps."""
    for bt in sorted((d for d in range(1, B + 1) if B % d == 0), reverse=True):
        if (bt * H) % 8 != 0 and bt != B:
            continue                              # keep output block sublane-aligned
        if two_cores and B >= 2 and (B // bt) < 2:
            continue                              # keep both v7x TensorCores fed
        if bt * H > 4096:
            continue                              # monster blocks: no extra benefit
        if fixed_bytes + bt * per_image_bytes > vmem_cap:
            continue
        return bt
    return 1 if H % 8 == 0 else B


# ---------------------------------------------------------------------------
# Forward: FanInInitReLULayer(layer_type='conv', kernel=3, padding=1) hot path.
# ---------------------------------------------------------------------------
@functools.partial(jax.jit, static_argnames=("cfg",))
def fan_in_conv_relu(x_nchw, params, cfg):
    wk, b_big = params
    B, Cin, H, W = x_nchw.shape
    assert (Cin, H, W) == (cfg.Cin, cfg.H, cfg.W)
    KH, K1, WCp, Hp_pad = cfg.KH, cfg.K1, cfg.WCp, cfg.Hp_pad
    pad = cfg.padding
    out_dtype = x_nchw.dtype

    # --- layout glue (kept in plain JAX for NCHW API fidelity; no-ops if the
    #     surrounding model is already NHWC) ---
    x = jnp.transpose(x_nchw, (0, 2, 3, 1))                                  # NHWC
    x = jnp.pad(x, ((0, 0), (pad, pad), (pad, pad), (0, 0)))                 # halo
    x2d = x.reshape(B, cfg.Hp, cfg.Wp * Cin)
    x2d = jnp.pad(x2d, ((0, 0), (0, Hp_pad - cfg.Hp), (0, K1 - cfg.Wp * Cin)))
    x2d = x2d.astype(jnp.bfloat16)                                           # (B,Hp_pad,K1)

    # --- generation-aware block size & VMEM budget ---
    vmem_phys, two_cores = _tpu_vmem_and_cores()
    vmem_cap = min(vmem_phys * 3 // 4, 100 * 1024 * 1024)
    out_isz = jnp.dtype(out_dtype).itemsize
    per_image = (2 * Hp_pad * K1 * 2             # double-buffered bf16 input block
                 + 2 * H * WCp * out_isz         # double-buffered output block
                 + H * KH * K1 * 2)              # in-kernel fused LHS slab (bf16)
    fixed = (2 * KH * K1 * WCp * 2               # weights (pipeline double-buffers)
             + 2 * WCp * 4                       # bias
             + (2 << 20))                        # compiler scratch slack
    bt = _pick_block_b(B, H, per_image, fixed, vmem_cap, two_cores)
    grid = (B // bt,)
    vmem_limit = int(min(max(2 * (fixed + bt * per_image), 32 * 1024 * 1024),
                         vmem_cap))

    cost = pl.CostEstimate(
        flops=2 * B * H * (KH * K1) * WCp,       # actual MXU MACs (incl. zero pad)
        transcendentals=0,
        bytes_accessed=int(x2d.size * 2 + wk.size * 2 + b_big.size * 4
                           + B * H * WCp * out_isz),
    )

    kernel = functools.partial(_conv_relu_kernel, KH=KH, H=H)

    out2d = pl.pallas_call(
        kernel,
        out_shape=jax.ShapeDtypeStruct((B * H, WCp), out_dtype),
        grid_spec=pltpu.PrefetchScalarGridSpec(
            num_scalar_prefetch=0,
            grid=grid,
            in_specs=[
                pl.BlockSpec((bt, Hp_pad, K1), lambda i: (i, 0, 0)),
                pl.BlockSpec((KH * K1, WCp), lambda i: (0, 0)),
                pl.BlockSpec((1, WCp), lambda i: (0, 0)),
            ],
            out_specs=pl.BlockSpec((bt * H, WCp), lambda i: (i, 0)),
        ),
        compiler_params=pltpu.CompilerParams(
            dimension_semantics=("parallel",),
            vmem_limit_bytes=vmem_limit,
        ),
        cost_estimate=cost,
    )(x2d, wk, b_big)

    out = out2d.reshape(B, H, W, cfg.Cout_p)[..., :cfg.Cout]
    return jnp.transpose(out, (0, 3, 1, 2))                                  # NHWC -> NCHW


# ---------------------------------------------------------------------------
# Deterministic parameter construction mirroring the module's __init__.
# ---------------------------------------------------------------------------
def make_params(key, inchan, outchan, kernel_size=3, init_scale=1.0):
    w = jax.random.normal(
        key, (outchan, inchan, kernel_size, kernel_size), dtype=jnp.float32)
    norm = jnp.sqrt(jnp.sum(w * w, axis=(1, 2, 3), keepdims=True))
    w = w * (init_scale / norm)                  # fan-in normalization
    b = jnp.zeros((outchan,), jnp.float32)       # bias zeroed by the module
    return w, b


def _reference_conv_relu(x_nchw, w_oihw, bias, padding=1):
    out = jax.lax.conv_general_dilated(
        x_nchw, w_oihw,
        window_strides=(1, 1),
        padding=[(padding, padding), (padding, padding)],
        dimension_numbers=("NCHW", "OIHW", "NCHW"),
        precision=jax.lax.Precision.HIGHEST,
    )
    out = out + bias[None, :, None, None]
    return jnp.maximum(out, 0.0)


if __name__ == "__main__":
    key = jax.random.PRNGKey(0)
    k_w, k_x = jax.random.split(key)

    B, Cin, H, W = 2, 4, 16, 16
    Cout = 32

    w, b = make_params(k_w, Cin, Cout, kernel_size=3, init_scale=1.0)
    x = jax.random.normal(k_x, (B, Cin, H, W), dtype=jnp.float32)

    # Weight preprocessing hoisted out of the per-forward path (done once).
    params, cfg = prepare_fan_in_conv_relu(w, b, H=H, W=W, padding=1)
    params = jax.block_until_ready(params)

    out = fan_in_conv_relu(x, params, cfg)
    out = jax.block_until_ready(out)

    # Reference on the same bf16-rounded operands the kernel feeds the MXU
    # (kernel accumulates in f32).
    x_r = x.astype(jnp.bfloat16).astype(jnp.float32)
    w_r = w.astype(jnp.bfloat16).astype(jnp.float32)
    ref = _reference_conv_relu(x_r, w_r, b, padding=1)

    assert out.shape == (B, Cout, H, W)
    assert jnp.allclose(out, ref, atol=1e-2, rtol=1e-2), "mismatch vs XLA reference"

    print("KERNEL_OK")
</pallas_src>

<mosaic_0001>
module attributes {stable_mosaic.version = 11 : i64} {
  func.func @_conv_relu_kernel(%arg0: i32, %arg1: memref<1x24x128xbf16, #tpu.memory_space<vmem>>, %arg2: memref<384x512xbf16, #tpu.memory_space<vmem>>, %arg3: memref<1x512xf32, #tpu.memory_space<vmem>>, %arg4: memref<16x512xf32, #tpu.memory_space<vmem>>) attributes {dimension_semantics = [#tpu.dimension_semantics<parallel>], iteration_bounds = array<i64: 2>, scalar_prefetch = 0 : i64, scratch_operands = 0 : i64, tpu.core_type = #tpu.core_type<tc>, window_params = [{transform_indices = @transform_0, window_bounds = array<i64: 1, 24, 128>}, {pipeline_mode = #tpu.pipeline_mode<synchronous>, transform_indices = @transform_1, window_bounds = array<i64: 384, 512>}, {pipeline_mode = #tpu.pipeline_mode<synchronous>, transform_indices = @transform_2, window_bounds = array<i64: 1, 512>}, {transform_indices = @transform_3, window_bounds = array<i64: 16, 512>}]} {
    %c0 = arith.constant 0 : index
    %c0_0 = arith.constant 0 : index
    %c0_1 = arith.constant 0 : index
    %0 = vector.load %arg1[%c0, %c0_0, %c0_1] : memref<1x24x128xbf16, #tpu.memory_space<vmem>>, vector<1x16x128xbf16>
    %1 = vector.shape_cast %0 : vector<1x16x128xbf16> to vector<16x128xbf16>
    %c0_2 = arith.constant 0 : index
    %c1 = arith.constant 1 : index
    %c0_3 = arith.constant 0 : index
    %2 = vector.load %arg1[%c0_2, %c1, %c0_3] : memref<1x24x128xbf16, #tpu.memory_space<vmem>>, vector<1x16x128xbf16>
    %3 = vector.shape_cast %2 : vector<1x16x128xbf16> to vector<16x128xbf16>
    %c0_4 = arith.constant 0 : index
    %c2 = arith.constant 2 : index
    %c0_5 = arith.constant 0 : index
    %4 = vector.load %arg1[%c0_4, %c2, %c0_5] : memref<1x24x128xbf16, #tpu.memory_space<vmem>>, vector<1x16x128xbf16>
    %5 = vector.shape_cast %4 : vector<1x16x128xbf16> to vector<16x128xbf16>
    %6 = tpu.concatenate %1, %3, %5 in 1 : vector<16x128xbf16>, vector<16x128xbf16>, vector<16x128xbf16> -> vector<16x384xbf16>
    %c0_6 = arith.constant 0 : index
    %c0_7 = arith.constant 0 : index
    %7 = vector.load %arg2[%c0_6, %c0_7] : memref<384x512xbf16, #tpu.memory_space<vmem>>, vector<384x512xbf16>
    %cst = arith.constant dense<0.000000e+00> : vector<16x512xf32>
    %8 = tpu.matmul %6, %7, %cst {dimension_numbers = #tpu.dot_dimension_numbers<[1], [0], [0], [1], [0, 0, 1, 1], [], []>} : vector<16x384xbf16>, vector<384x512xbf16>, vector<16x512xf32> -> vector<16x512xf32>
    %c0_8 = arith.constant 0 : index
    %c0_9 = arith.constant 0 : index
    %9 = vector.load %arg3[%c0_8, %c0_9] : memref<1x512xf32, #tpu.memory_space<vmem>>, vector<1x512xf32>
    %10 = vector.broadcast %9 : vector<1x512xf32> to vector<16x512xf32>
    %11 = arith.addf %8, %10 : vector<16x512xf32>
    %cst_10 = arith.constant 0.000000e+00 : f32
    %12 = vector.broadcast %cst_10 : f32 to vector<16x512xf32>
    %13 = arith.maximumf %11, %12 : vector<16x512xf32>
    %c0_11 = arith.constant 0 : index
    %c0_12 = arith.constant 0 : index
    %14 = vector.load %arg4[%c0_11, %c0_12] : memref<16x512xf32, #tpu.memory_space<vmem>>, vector<16x512xf32>
    tpu.vector_store %arg4[%c0_11, %c0_12], %13 {strides = array<i32>} : memref<16x512xf32, #tpu.memory_space<vmem>>, vector<16x512xf32>,
    return
  }
  func.func @transform_0(%arg0: i32) -> (i32, i32, i32) {
    %c0_i32 = arith.constant 0 : i32
    %c0_i32_0 = arith.constant 0 : i32
    %c0_i32_1 = arith.constant 0 : i32
    return %arg0, %c0_i32, %c0_i32_0 : i32, i32, i32
  }
  func.func @transform_1(%arg0: i32) -> (i32, i32) {
    %c0_i32 = arith.constant 0 : i32
    %c0_i32_0 = arith.constant 0 : i32
    %c0_i32_1 = arith.constant 0 : i32
    return %c0_i32, %c0_i32_0 : i32, i32
  }
  func.func @transform_2(%arg0: i32) -> (i32, i32) {
    %c0_i32 = arith.constant 0 : i32
    %c0_i32_0 = arith.constant 0 : i32
    %c0_i32_1 = arith.constant 0 : i32
    return %c0_i32, %c0_i32_0 : i32, i32
  }
  func.func @transform_3(%arg0: i32) -> (i32, i32) {
    %c0_i32 = arith.constant 0 : i32
    %c0_i32_0 = arith.constant 0 : i32
    return %arg0, %c0_i32 : i32, i32
  }
}

</mosaic_0001>

<bundles_post_ra>
// kernel: fan_in_conv_relu.1
= control target key start
LH: loop header
LB: loop body
LE: loop exit
PB: predicated region body
PF: predicated region fallthrough
CT: control target
= control target key end

     0   :  { %8 = vsyncpa [#allocation3], 0  ;;  %s1435_s12 = smov 0   ;;  %s1505_s0 = inlined_call_operand.vmem [shape: bf16[2,24,128], index: 0, kind: input, shape index: {}]   ;;  %s1506_s1 = inlined_call_operand.hbm [shape: bf16[384,512], index: 1, kind: input, shape index: {}]   ;;  %s1507_s2 = inlined_call_operand.vmem [shape: f32[1,512], index: 2, kind: input, shape index: {}]   ;;  %s1508_s3 = inlined_call_operand.vmem [shape: f32[32,512], index: 3, kind: output, shape index: {}]  }
   0x1 LB: > { %s1441_s13 = sadd.s32 4294967295, %s1409_s12   ;;  %p1090_p0 = scmp.ge.s32.totalorder %s1409_s12, 1  ;;  %s1409_s12 = sphi %s1435_s12, %s14_s12  }
   0x2   : > { %p113_p1 = scmp.lt.s32.totalorder %s1409_s12, 3  ;;  %s1411_s14 = smov [#allocation2]  }
   0x3   : > { %s125_s15 = sshll.u32 %s1411_s14, 4  ;;  %p1211_p3 = scmp.eq.s32.totalorder %s1441_s13, 0  ;;  %s126_s15 = int_to_ptr.vmem [resolvable:$true] %s125_s15 }
   0x4   : > { %p1445_p2 = pnand %p1090_p0, %p113_p1  ;;  %s1384_s17 = scalar_lea.vmem %s126_s15, 12288 }
   0x5   : > { %p1385_p7 = scmp.ne.s32.totalorder %s126_s15, %s1384_s17  ;;  %p1392_p10 = scmp.lt.s32.totalorder %s126_s15, %s126_s15 }
   0x6   : > { %p1207_p4 = pneg %p1445_p2  ;;  %p1393_p11 = scmp.lt.s32.totalorder %s1384_s17, %s1384_s17 }
   0x8   : > { %p1208_p5 = pnand %p1211_p3, %p1207_p4  ;;  %p1394_p12 = por %p1393_p11, %p1392_p10 }
   0xa   : > { %p1375_p6 = pneg %p1208_p5 }
   0xc   : > { %p1387_p8 = pnand %p1385_p7, %p1375_p6 }
   0xe   : > { %p1388_p9 = pneg %p1387_p8 }
  0x10   : > { %p1395_p13 = pnand %p1394_p12, %p1388_p9 }
  0x12   : > { %1398 = shalt.err (!%p1395_p13)
}
  0x13   : > { %s1412_s18 = smov 256   ;;  %s1413_s19 = smov 16  }
  0x14   : > { %1210 = dma.hbm_to_vmem [thread:$0]  (!%p1208_p5), %s1506_s1, 12288, %s126_s15, [#allocation3], %s1412_s18, %s1412_s18, %s1413_s19  }
  0x15   : > { %152 = sbr.rel (%p1445_p2) target bundleno = 331 (0x14b), region = 32 }
  0x1a   : > { %1404 = dma.done.wait (%p1211_p3), [#allocation3], 12288  }
  0x1b   : > { %1406 = vsyncadd (%p1211_p3), [#allocation3], 4294955008  ;;  %v1414_v0 = vmov 0   ;;  %v1225_v1 = vld [vmem:[#allocation2 + $0xe4] ss:$16 sps:$4 sm:$0xff]   ;;  %p177_p0 = scmp.lt.s32.totalorder %s1441_s13, 1 }
  0x1c   : > { %905 = vmatprep.mubr.bf16.mxu1 %v1414_v0  ;;  %v1227_v2 = vld [vmem:[#allocation2 + $0x2e4] ss:$16 sps:$4 sm:$0xff]   ;;  %830 = vmatprep.subr.bf16.mxu0 %v1225_v1  ;;  %v1229_v3 = vld [vmem:[#allocation2 + $0xe0] ss:$16 sps:$4 sm:$0xff]   ;;  %vm227_vm0 = vcmask 1046528   ;;  %s1096_s27 = sshll.u32 %s1441_s13, 1 }
  0x1d   : > { %v1230_v4 = vld [vmem:[#allocation2 + $0x2e0] ss:$16 sps:$4 sm:$0xff]   ;;  %873 = vmatprep.subr.bf16.mxu1 %v1227_v2  ;;  %v1231_v5 = vld [vmem:[#allocation2 + $0xc4] ss:$16 sps:$4 sm:$0xff]   ;;  %831 = vmatpush1.bf16.msra.mxu0 %v1229_v3  ;;  %s178_s22 = scalar_select %p177_p0, %s1441_s13, 1 }
  0x1e   : > { %874 = vmatpush1.bf16.msra.mxu1 %v1230_v4  ;;  %v1233_v6 = vld [vmem:[#allocation2 + $0x2c4] ss:$16 sps:$4 sm:$0xff]   ;;  %v1235_v7 = vld [vmem:[#allocation2 + $0xc0] ss:$16 sps:$4 sm:$0xff]   ;;  %832 = vmatprep.subr.bf16.mxu0 %v1231_v5  ;;  %v1280_v45 = vld [vmem:[#allocation2 + $0xec] ss:$16 sps:$4 sm:$0xff]  }
  0x1f   : > { %v1236_v8 = vld [vmem:[#allocation2 + $0x2c0] ss:$16 sps:$4 sm:$0xff]   ;;  %875 = vmatprep.subr.bf16.mxu1 %v1233_v6  ;;  %v1237_v9 = vld [vmem:[#allocation2 + $0xa4] ss:$16 sps:$4 sm:$0xff]   ;;  %s1202_s23 = smul.u32 12, %s178_s22  ;;  %p183_p1 = scmp.lt.s32.totalorder %s1096_s27, 3 }
  0x20   : > { %v1239_v10 = vld [vmem:[#allocation2 + $0x2a4] ss:$16 sps:$4 sm:$0xff]   ;;  %v1241_v11 = vld [vmem:[#allocation2 + $0xa0] ss:$16 sps:$4 sm:$0xff]   ;;  %vm210_vm1 = vsmask.f32 7424 }
  0x21   : > { %v1242_v12 = vld [vmem:[#allocation2 + $0x2a0] ss:$16 sps:$4 sm:$0xff]   ;;  %833 = vmatpush1.bf16.msra.mxu0 %v1235_v7  ;;  %v1243_v13 = vld [vmem:[#allocation2 + $0x84] ss:$16 sps:$4 sm:$0xff]   ;;  %s1469_s26 = scalar_lea.vmem %s1505_s0, %s1202_s23  ;;  %v1278_v47 = vld [vmem:[#allocation2 + $0xe8] ss:$16 sps:$4 sm:$0xff]  }
  0x22   : > { %876 = vmatpush1.bf16.msra.mxu1 %v1236_v8  ;;  %834 = vmatprep.subr.bf16.mxu0 %v1237_v9  ;;  %v1245_v14 = vld [vmem:[#allocation2 + $0x284] ss:$16 sps:$4 sm:$0xff]   ;;  %v1247_v15 = vld [vmem:[#allocation2 + $0x80] ss:$16 sps:$4 sm:$0xff]   ;;  %v1286_v53 = vld [vmem:[#allocation2 + $0xcc] ss:$16 sps:$4 sm:$0xff]  }
  0x23   : > { %877 = vmatprep.subr.bf16.mxu1 %v1239_v10  ;;  %v1248_v16 = vld [vmem:[#allocation2 + $0x280] ss:$16 sps:$4 sm:$0xff]   ;;  %v1249_v17 = vld [vmem:[#allocation2 + $0x64] ss:$16 sps:$4 sm:$0xff]   ;;  %v1284_v55 = vld [vmem:[#allocation2 + $0xc8] ss:$16 sps:$4 sm:$0xff]  }
  0x24   : > { %v1251_v18 = vld [vmem:[#allocation2 + $0x264] ss:$16 sps:$4 sm:$0xff]   ;;  %v1253_v19 = vld [vmem:[#allocation2 + $0x60] ss:$16 sps:$4 sm:$0xff]   ;;  %v1292_v58 = vld [vmem:[#allocation2 + $0xac] ss:$16 sps:$4 sm:$0xff]  }
  0x25   : > { %835 = vmatpush1.bf16.msra.mxu0 %v1241_v11  ;;  %v1254_v20 = vld [vmem:[#allocation2 + $0x260] ss:$16 sps:$4 sm:$0xff]   ;;  %v1255_v21 = vld [vmem:[#allocation2 + $0x44] ss:$16 sps:$4 sm:$0xff]   ;;  %v1290_v59 = vld [vmem:[#allocation2 + $0xa8] ss:$16 sps:$4 sm:$0xff]  }
  0x26   : > { %878 = vmatpush1.bf16.msra.mxu1 %v1242_v12  ;;  %836 = vmatprep.subr.bf16.mxu0 %v1243_v13  ;;  %v1257_v22 = vld [vmem:[#allocation2 + $0x244] ss:$16 sps:$4 sm:$0xff]   ;;  %v1259_v23 = vld [vmem:[#allocation2 + $0x40] ss:$16 sps:$4 sm:$0xff]   ;;  %v1298_v62 = vld [vmem:[#allocation2 + $0x8c] ss:$16 sps:$4 sm:$0xff]  }
  0x27   : > { %879 = vmatprep.subr.bf16.mxu1 %v1245_v14  ;;  %v1260_v24 = vld [vmem:[#allocation2 + $0x240] ss:$16 sps:$4 sm:$0xff]   ;;  %v1261_v25 = vld [vmem:[#allocation2 + $0x24] ss:$16 sps:$4 sm:$0xff]   ;;  %v1296_v63 = vld [vmem:[#allocation2 + $0x88] ss:$16 sps:$4 sm:$0xff]  }
  0x28   : > { %v1263_v26 = vld [vmem:[#allocation2 + $0x224] ss:$16 sps:$4 sm:$0xff]   ;;  %v1265_v27 = vld [vmem:[#allocation2 + $0x20] ss:$16 sps:$4 sm:$0xff]   ;;  %v1304_v3 = vld [vmem:[#allocation2 + $0x6c] ss:$16 sps:$4 sm:$0xff]  }
  0x29   : > { %837 = vmatpush1.bf16.msra.mxu0 %v1247_v15  ;;  %v192_v28 = vld [vmem:[%s1469_s26] sm:$0xf]  ;;  %v193_v29 = vld [vmem:[%s1469_s26 + $0x4] sm:$0xf]  ;;  %v1302_v4 = vld [vmem:[#allocation2 + $0x68] ss:$16 sps:$4 sm:$0xff]  }
  0x2a   : > { %880 = vmatpush1.bf16.msra.mxu1 %v1248_v16  ;;  %838 = vmatprep.subr.bf16.mxu0 %v1249_v17  ;;  %v195_v30 = vld [vmem:[%s1469_s26] sm:$0xe]  ;;  %v1100_v31 = vcombine.low %v192_v28, %v193_v29  ;;  %v1276_v33 = vld [vmem:[%s1469_s26 + $0x8] ss:$0 sps:$4 sm:$0x11]   ;;  %s1511_s27 = smov (!%p183_p1, %s1096_s27), 3 }
  0x2b   : > { %881 = vmatprep.subr.bf16.mxu1 %v1251_v18  ;;  %v1266_v32 = vld [vmem:[#allocation2 + $0x220] ss:$16 sps:$4 sm:$0xff]   ;;  %v1102_v34 = vcombine.low %v195_v30, %v193_v29  ;;  %v1267_v35 = vld [vmem:[#allocation2 + $0x4] ss:$16 sps:$4 sm:$0xff]   ;;  %v229_v43 = vrot.slane %v1276_v33, 1  ;;  %v219_v44 = vshll.u32 %v1276_v33, 16 }
  0x2c   : > { %v1269_v36 = vld [vmem:[#allocation2 + $0x204] ss:$16 sps:$4 sm:$0xff]   ;;  %v1271_v37 = vld [vmem:[#allocation2] ss:$16 sps:$4 sm:$0xff]   ;;  %v212_v40 = vshrl.u32 %v1100_v31, 16  ;;  %v214_v41 = vshll.u32 %v1100_v31, 16 }
  0x2d   : > { %839 = vmatpush1.bf16.msra.mxu0 %v1253_v19  ;;  %v1272_v38 = vld [vmem:[#allocation2 + $0x200] ss:$16 sps:$4 sm:$0xff]   ;;  %v1273_v39 = vld [vmem:[#allocation2 + $0x1e4] ss:$16 sps:$4 sm:$0xff]   ;;  %v228_v42 = vrot.slane %v1102_v34, 1  ;;  %v221_v49 = vrot.slane %v219_v44, 1 }
  0x2e   : > { %882 = vmatpush1.bf16.msra.mxu1 %v1254_v20  ;;  %840 = vmatprep.subr.bf16.mxu0 %v1255_v21  ;;  %v216_v46 = vrot.slane %v214_v41, 1  ;;  %v1281_v51 = vld [vmem:[#allocation2 + $0x1e0] ss:$16 sps:$4 sm:$0xff]   ;;  %v1282_v52 = vld [vmem:[#allocation2 + $0x1c4] ss:$16 sps:$4 sm:$0xff]   ;;  %s1201_s30 = sshll.u32 %s1511_s27, 5 }
  0x2f   : > { %883 = vmatprep.subr.bf16.mxu1 %v1257_v22  ;;  %v1475_v50 = vsel %vm227_vm0, %v228_v42, %v229_v43  ;;  %v1287_v56 = vld [vmem:[#allocation2 + $0x1c0] ss:$16 sps:$4 sm:$0xff]   ;;  %v1288_v57 = vld [vmem:[#allocation2 + $0x1a4] ss:$16 sps:$4 sm:$0xff]   ;;  %v1310_v7 = vld [vmem:[#allocation2 + $0x4c] ss:$16 sps:$4 sm:$0xff]   ;;  %s1492_s6 = scalar_lea.vmem %s1508_s3, %s1201_s30 }
  0x30   : > { %v217_v48 = vor.u32 %v216_v46, %v212_v40  ;;  %v1293_v60 = vld [vmem:[#allocation2 + $0x1a0] ss:$16 sps:$4 sm:$0xff]   ;;  %v1294_v61 = vld [vmem:[#allocation2 + $0x184] ss:$16 sps:$4 sm:$0xff]   ;;  %v1308_v8 = vld [vmem:[#allocation2 + $0x48] ss:$16 sps:$4 sm:$0xff]  }
  0x31   : > { %841 = vmatpush1.bf16.msra.mxu0 %v1259_v23  ;;  %v1299_v1 = vld [vmem:[#allocation2 + $0x180] ss:$16 sps:$4 sm:$0xff]   ;;  %v1300_v2 = vld [vmem:[#allocation2 + $0x164] ss:$16 sps:$4 sm:$0xff]   ;;  %v1316_v11 = vld [vmem:[#allocation2 + $0x2c] ss:$16 sps:$4 sm:$0xff]  }
  0x32   : > { %884 = vmatpush1.bf16.msra.mxu1 %v1260_v24  ;;  %842 = vmatprep.subr.bf16.mxu0 %v1261_v25  ;;  %v222_v54 = vsel %vm210_vm1, %v217_v48, %v221_v49  ;;  %v1305_v5 = vld [vmem:[#allocation2 + $0x160] ss:$16 sps:$4 sm:$0xff]   ;;  %v1306_v6 = vld [vmem:[#allocation2 + $0x144] ss:$16 sps:$4 sm:$0xff]   ;;  %v1314_v12 = vld [vmem:[#allocation2 + $0x28] ss:$16 sps:$4 sm:$0xff]  }
  0x33   : > { %885 = vmatprep.subr.bf16.mxu1 %v1263_v26  ;;  %862 = vmatprep.mubr.bf16.mxu0 %v222_v54  ;;  %v1311_v9 = vld [vmem:[#allocation2 + $0x140] ss:$16 sps:$4 sm:$0xff]   ;;  %v1312_v10 = vld [vmem:[#allocation2 + $0x124] ss:$16 sps:$4 sm:$0xff]   ;;  %v1322_v15 = vld [vmem:[#allocation2 + $0xc] ss:$16 sps:$4 sm:$0xff]  }
  0x34   : > { %v1317_v13 = vld [vmem:[#allocation2 + $0x120] ss:$16 sps:$4 sm:$0xff]   ;;  %v1318_v14 = vld [vmem:[#allocation2 + $0x104] ss:$16 sps:$4 sm:$0xff]   ;;  %v1320_v16 = vld [vmem:[#allocation2 + $0x8] ss:$16 sps:$4 sm:$0xff]  }
  0x35   : > { %843 = vmatpush1.bf16.msra.mxu0 %v1265_v27  ;;  %v1323_v17 = vld [vmem:[#allocation2 + $0x100] ss:$16 sps:$4 sm:$0xff]   ;;  %v1327_v18 = vld [vmem:[#allocation2 + $0x1ec] ss:$16 sps:$4 sm:$0xff]   ;;  %v1325_v21 = vld [vmem:[#allocation2 + $0x1e8] ss:$16 sps:$4 sm:$0xff]  }
  0x36   : > { %886 = vmatpush1.bf16.msra.mxu1 %v1266_v32  ;;  %844 = vmatprep.subr.bf16.mxu0 %v1267_v35  ;;  %v1330_v19 = vld [vmem:[#allocation2 + $0x2ec] ss:$16 sps:$4 sm:$0xff]   ;;  %v1479_v20 = vld [vmem:[%s1469_s26] sm:$0xff]   ;;  %v1328_v22 = vld [vmem:[#allocation2 + $0x2e8] ss:$16 sps:$4 sm:$0xff]  }
  0x37   : > { %887 = vmatprep.subr.bf16.mxu1 %v1269_v36  ;;  %v1333_v23 = vld [vmem:[#allocation2 + $0x1cc] ss:$16 sps:$4 sm:$0xff]   ;;  %v1331_v25 = vld [vmem:[#allocation2 + $0x1c8] ss:$16 sps:$4 sm:$0xff]  }
  0x38   : > { %v1336_v24 = vld [vmem:[#allocation2 + $0x2cc] ss:$16 sps:$4 sm:$0xff]   ;;  %v1334_v26 = vld [vmem:[#allocation2 + $0x2c8] ss:$16 sps:$4 sm:$0xff]  }
  0x39   : > { %845 = vmatpush1.bf16.msra.mxu0 %v1271_v37  ;;  %v1339_v27 = vld [vmem:[#allocation2 + $0x1ac] ss:$16 sps:$4 sm:$0xff]   ;;  %v1337_v29 = vld [vmem:[#allocation2 + $0x1a8] ss:$16 sps:$4 sm:$0xff]  }
  0x3a   : > { %888 = vmatpush1.bf16.msra.mxu1 %v1272_v38  ;;  %846 = vmatprep.subr.bf16.mxu0 %v1273_v39  ;;  %v1342_v28 = vld [vmem:[#allocation2 + $0x2ac] ss:$16 sps:$4 sm:$0xff]   ;;  %v1340_v30 = vld [vmem:[#allocation2 + $0x2a8] ss:$16 sps:$4 sm:$0xff]  }
  0x3b   : > { %916 = vmatprep.subr.bf16.mxu1 %v1280_v45  ;;  %v1345_v31 = vld [vmem:[#allocation2 + $0x18c] ss:$16 sps:$4 sm:$0xff]   ;;  %v1343_v33 = vld [vmem:[#allocation2 + $0x188] ss:$16 sps:$4 sm:$0xff]  }
  0x3c   : > { %v1348_v32 = vld [vmem:[#allocation2 + $0x28c] ss:$16 sps:$4 sm:$0xff]   ;;  %v1346_v34 = vld [vmem:[#allocation2 + $0x288] ss:$16 sps:$4 sm:$0xff]  }
  0x3d   : > { %906 = vmatmul.mubr.bf16.vlgmr.msra.gmra.mxu1 %v1475_v50  ;;  %847 = vmatpush2.bf16.msra.mxu0 %v1281_v51  ;;  %v1351_v35 = vld [vmem:[#allocation2 + $0x16c] ss:$16 sps:$4 sm:$0xff]   ;;  %v1349_v37 = vld [vmem:[#allocation2 + $0x168] ss:$16 sps:$4 sm:$0xff]   ;;  %v330_v51 = vlaneseq }
  0x3e   : > { %917 = vmatpush1.bf16.msra.mxu1 %v1278_v47  ;;  %848 = vmatprep.subr.bf16.mxu0 %v1282_v52  ;;  %v1354_v36 = vld [vmem:[#allocation2 + $0x26c] ss:$16 sps:$4 sm:$0xff]   ;;  %v1355_v40 = vld [vmem:[#allocation2 + $0x148] ss:$16 sps:$4 sm:$0xff]  }
  0x3f   : > { %918 = vmatprep.subr.bf16.mxu1 %v1286_v53  ;;  %948 = vmatprep.mubr.bf16.mxu1 %v222_v54  ;;  %v1357_v38 = vld [vmem:[#allocation2 + $0x14c] ss:$16 sps:$4 sm:$0xff]   ;;  %v1358_v41 = vld [vmem:[#allocation2 + $0x248] ss:$16 sps:$4 sm:$0xff]   ;;  %v331_v52 = vshrl.u32 %v330_v51, 7 }
  0x40   : > { %v1360_v39 = vld [vmem:[#allocation2 + $0x24c] ss:$16 sps:$4 sm:$0xff]   ;;  %v1361_v44 = vld [vmem:[#allocation2 + $0x128] ss:$16 sps:$4 sm:$0xff]   ;;  %v328_v54 = vld [vmem:[%s1507_s2] sm:$0xf] }
  0x41   : > { %849 = vmatpush2.bf16.msra.mxu0 %v1287_v56  ;;  %v1363_v42 = vld [vmem:[#allocation2 + $0x12c] ss:$16 sps:$4 sm:$0xff]   ;;  %v1364_v45 = vld [vmem:[#allocation2 + $0x228] ss:$16 sps:$4 sm:$0xff]   ;;  %v332_v53 = vsub.s32 0, %v331_v52 }
  0x42   : > { %919 = vmatpush1.bf16.msra.mxu1 %v1284_v55  ;;  %850 = vmatprep.subr.bf16.mxu0 %v1288_v57  ;;  %v1366_v43 = vld [vmem:[#allocation2 + $0x22c] ss:$16 sps:$4 sm:$0xff]   ;;  %v1367_v48 = vld [vmem:[#allocation2 + $0x108] ss:$16 sps:$4 sm:$0xff]   ;;  %v336_v55 = vsub.s32 1, %v331_v52 }
  0x43   : > { %920 = vmatprep.subr.bf16.mxu1 %v1292_v58  ;;  %v1369_v46 = vld [vmem:[#allocation2 + $0x10c] ss:$16 sps:$4 sm:$0xff]   ;;  %v1370_v49 = vld [vmem:[#allocation2 + $0x208] ss:$16 sps:$4 sm:$0xff]   ;;  %v333_v57 = vrot.slane %v328_v54, %v332_v53 }
  0x44   : > { %v1372_v47 = vld [vmem:[#allocation2 + $0x20c] ss:$16 sps:$4 sm:$0xff]   ;;  %v337_v58 = vrot.slane %v328_v54, %v336_v55 }
  0x45   : > { %851 = vmatpush2.bf16.msra.mxu0 %v1293_v60 }
  0x46   : > { %921 = vmatpush1.bf16.msra.mxu1 %v1290_v59  ;;  %852 = vmatprep.subr.bf16.mxu0 %v1294_v61 }
  0x47   : > { %922 = vmatprep.subr.bf16.mxu1 %v1298_v62 }
  0x49   : > { %853 = vmatpush2.bf16.msra.mxu0 %v1299_v1 }
  0x4a   : > { %923 = vmatpush1.bf16.msra.mxu1 %v1296_v63  ;;  %854 = vmatprep.subr.bf16.mxu0 %v1300_v2 }
  0x4b   : > { %924 = vmatprep.subr.bf16.mxu1 %v1304_v3 }
  0x4d   : > { %855 = vmatpush2.bf16.msra.mxu0 %v1305_v5 }
  0x4e   : > { %925 = vmatpush1.bf16.msra.mxu1 %v1302_v4  ;;  %856 = vmatprep.subr.bf16.mxu0 %v1306_v6 }
  0x4f   : > { %926 = vmatprep.subr.bf16.mxu1 %v1310_v7 }
  0x51   : > { %857 = vmatpush2.bf16.msra.mxu0 %v1311_v9 }
  0x52   : > { %927 = vmatpush1.bf16.msra.mxu1 %v1308_v8  ;;  %858 = vmatprep.subr.bf16.mxu0 %v1312_v10 }
  0x53   : > { %928 = vmatprep.subr.bf16.mxu1 %v1316_v11 }
  0x55   : > { %859 = vmatpush2.bf16.msra.mxu0 %v1317_v13 }
  0x56   : > { %929 = vmatpush1.bf16.msra.mxu1 %v1314_v12  ;;  %860 = vmatprep.subr.bf16.mxu0 %v1318_v14  ;;  %v340_v14 = vsub.s32 2, %v331_v52 }
  0x57   : > { %930 = vmatprep.subr.bf16.mxu1 %v1322_v15  ;;  %v344_v15 = vsub.s32 3, %v331_v52 }
  0x59   : > { %861 = vmatpush2.bf16.msra.mxu0 %v1323_v17  ;;  %v345_v17 = vrot.slane %v328_v54, %v344_v15 }
  0x5a   : > { %931 = vmatpush1.bf16.msra.mxu1 %v1320_v16  ;;  %959 = vmatprep.subr.bf16.mxu0 %v1330_v19  ;;  %v341_v16 = vrot.slane %v328_v54, %v340_v14 }
  0x5b   : > { %932 = vmatprep.subr.bf16.mxu1 %v1327_v18 }
  0x5c   : > { %863 = vmatmul.mubr.bf16.vlgmr.msra.gmra.mxu0 %v1479_v20 }
  0x5d   : > { %960 = vmatpush1.bf16.msra.mxu0 %v1328_v22  ;;  %991 = vmatprep.mubr.bf16.mxu0 %v1414_v0  ;;  %v1352_v0 = vld [vmem:[#allocation2 + $0x268] ss:$16 sps:$4 sm:$0xff]  }
  0x5e   : > { %933 = vmatpush2.bf16.msra.mxu1 %v1325_v21  ;;  %961 = vmatprep.subr.bf16.mxu0 %v1336_v24 }
  0x5f   : > { %934 = vmatprep.subr.bf16.mxu1 %v1333_v23 }
  0x61   : > { %962 = vmatpush1.bf16.msra.mxu0 %v1334_v26 }
  0x62   : > { %935 = vmatpush2.bf16.msra.mxu1 %v1331_v25  ;;  %963 = vmatprep.subr.bf16.mxu0 %v1342_v28 }
  0x63   : > { %936 = vmatprep.subr.bf16.mxu1 %v1339_v27 }
  0x65   : > { %964 = vmatpush1.bf16.msra.mxu0 %v1340_v30 }
  0x66   : > { %937 = vmatpush2.bf16.msra.mxu1 %v1337_v29  ;;  %965 = vmatprep.subr.bf16.mxu0 %v1348_v32 }
  0x67   : > { %938 = vmatprep.subr.bf16.mxu1 %v1345_v31 }
  0x69   : > { %966 = vmatpush1.bf16.msra.mxu0 %v1346_v34 }
  0x6a   : > { %939 = vmatpush2.bf16.msra.mxu1 %v1343_v33  ;;  %967 = vmatprep.subr.bf16.mxu0 %v1354_v36 }
  0x6b   : > { %940 = vmatprep.subr.bf16.mxu1 %v1351_v35 }
  0x6d   : > { %968 = vmatpush1.bf16.msra.mxu0 %v1352_v0 }
  0x6e   : > { %941 = vmatpush2.bf16.msra.mxu1 %v1349_v37  ;;  %969 = vmatprep.subr.bf16.mxu0 %v1360_v39 }
  0x6f   : > { %942 = vmatprep.subr.bf16.mxu1 %v1357_v38 }
  0x71   : > { %970 = vmatpush1.bf16.msra.mxu0 %v1358_v41 }
  0x72   : > { %943 = vmatpush2.bf16.msra.mxu1 %v1355_v40  ;;  %971 = vmatprep.subr.bf16.mxu0 %v1366_v43 }
  0x73   : > { %944 = vmatprep.subr.bf16.mxu1 %v1363_v42 }
  0x75   : > { %972 = vmatpush1.bf16.msra.mxu0 %v1364_v45 }
  0x76   : > { %945 = vmatpush2.bf16.msra.mxu1 %v1361_v44  ;;  %973 = vmatprep.subr.bf16.mxu0 %v1372_v47 }
  0x77   : > { %946 = vmatprep.subr.bf16.mxu1 %v1369_v46 }
  0x79   : > { %974 = vmatpush1.bf16.msra.mxu0 %v1370_v49 }
  0x7a   : > { %947 = vmatpush2.bf16.msra.mxu1 %v1367_v48 }
  0x7c   : > { %992 = vmatmul.mubr.bf16.vlgmr.msra.gmra.mxu0 %v1475_v50 }
  0x7d   : > { %949 = vmatmul.mubr.bf16.vlgmr.msra.gmra.mxu1 %v1479_v20 }
  0xfd   : > { %v907_v56 = vpop.f32.mrf.mxu1 }
  0xff   : > { %v909_v59 = vpop.f32.mrf.mxu1 }
 0x101   : > { %v911_v1 = vpop.f32.mrf.mxu1 }
 0x103   : > { %v913_v10 = vpop.f32.mrf.mxu1 }
 0x11c   : > { %v864_v60 = vpop.f32.mrf.mxu0 }
 0x11d   : > { %v865_v61 = vadd.f32 %v864_v60, %v333_v57 }
 0x11e   : > { %v866_v62 = vpop.f32.mrf.mxu0 }
 0x11f   : > { %v908_v50 = vadd.f32 %v907_v56, %v865_v61  ;;  %v867_v63 = vadd.f32 %v866_v62, %v337_v58 }
 0x120   : > { %v868_v2 = vpop.f32.mrf.mxu0 }
 0x121   : > { %v1002_v3 = vmax.f32 %v908_v50, 0.0  ;;  %v910_v4 = vadd.f32 %v909_v59, %v867_v63  ;;  %v869_v5 = vadd.f32 %v868_v2, %v333_v57 }
 0x122   : > { %v870_v6 = vpop.f32.mrf.mxu0 }
 0x123   : > { %1010 = vst [vmem:[%s1492_s6] sm:$0xff] %v1002_v3  ;;  %v1003_v7 = vmax.f32 %v910_v4, 0.0  ;;  %v912_v8 = vadd.f32 %v911_v1, %v869_v5  ;;  %v871_v9 = vadd.f32 %v870_v6, %v337_v58 }
 0x125   : > { %1011 = vst [vmem:[%s1492_s6 + $0x8] sm:$0xff] %v1003_v7  ;;  %v1006_v11 = vmax.f32 %v912_v8, 0.0  ;;  %v914_v12 = vadd.f32 %v913_v10, %v871_v9 }
 0x127   : > { %1014 = vst [vmem:[%s1492_s6 + $0x20] sm:$0xff] %v1006_v11  ;;  %v1007_v13 = vmax.f32 %v914_v12, 0.0 }
 0x129   : > { %1015 = vst [vmem:[%s1492_s6 + $0x28] sm:$0xff] %v1007_v13 }
 0x13c   : > { %v993_v19 = vpop.f32.mrf.mxu0 }
 0x13d   : > { %v950_v18 = vpop.f32.mrf.mxu1 }
 0x13e   : > { %v951_v20 = vadd.f32 %v950_v18, %v341_v16  ;;  %v995_v22 = vpop.f32.mrf.mxu0 }
 0x13f   : > { %v952_v21 = vpop.f32.mrf.mxu1 }
 0x140   : > { %v994_v23 = vadd.f32 %v993_v19, %v951_v20  ;;  %v953_v24 = vadd.f32 %v952_v21, %v345_v17  ;;  %v997_v26 = vpop.f32.mrf.mxu0 }
 0x141   : > { %v954_v25 = vpop.f32.mrf.mxu1 }
 0x142   : > { %v1004_v27 = vmax.f32 %v994_v23, 0.0  ;;  %v996_v28 = vadd.f32 %v995_v22, %v953_v24  ;;  %v955_v29 = vadd.f32 %v954_v25, %v341_v16  ;;  %v999_v34 = vpop.f32.mrf.mxu0 }
 0x143   : > { %v956_v30 = vpop.f32.mrf.mxu1 }
 0x144   : > { %1012 = vst [vmem:[%s1492_s6 + $0x10] sm:$0xff] %v1004_v27  ;;  %v1005_v31 = vmax.f32 %v996_v28, 0.0  ;;  %v998_v32 = vadd.f32 %v997_v26, %v955_v29  ;;  %v957_v33 = vadd.f32 %v956_v30, %v345_v17 }
 0x146   : > { %1013 = vst [vmem:[%s1492_s6 + $0x18] sm:$0xff] %v1005_v31  ;;  %v1008_v35 = vmax.f32 %v998_v32, 0.0  ;;  %v1000_v36 = vadd.f32 %v999_v34, %v957_v33 }
 0x148   : > { %1016 = vst [vmem:[%s1492_s6 + $0x30] sm:$0xff] %v1008_v35  ;;  %v1009_v37 = vmax.f32 %v1000_v36, 0.0 }
 0x14a   : > { %1017 = vst [vmem:[%s1492_s6 + $0x38] sm:$0xff] %v1009_v37 }
 0x14b PF: > { %s14_s12 = sadd.s32 1, %s1409_s12  }
 0x14c   : > { %p11_p2 = scmp.ge.s32.totalorder %s14_s12, 4  }
 0x14e   :  { %13 = sbr.rel (!%p11_p2) target bundleno = 1 (0x1), region = 67 }
 0x153   :  { %1042 = vsyncpa [#allocation3], 1 }
 0x154   :  { %1044 = vsyncpa [#allocation3 + $0x1], 1 }

</bundles_post_ra>
